<compile_context>
chip_gen: v7x
topology: tpu7x:2x2x1
jax: 0.10.0
libtpu: 0.0.40
codegen_flags: <defaults>
</compile_context>

<pallas_src>
import functools

import jax
import jax.numpy as jnp
from jax.experimental import pallas as pl
from jax.experimental.pallas import tpu as pltpu

_LANES = 128
_SUBLANES = 8

# Padded bytes allowed for ONE (x block + mask block) pair.
_TARGET_BLOCK_BYTES = 2 * 1024 * 1024

# Channel tile: full C when modest, else 512 lanes (multiple of 128, so the
# BlockSpec last-two-dims rule holds and partial C tails are legal).
_MAX_TC = 512


def _round_up(x, m):
    return (x + m - 1) // m * m


def _tile_sizes(B, T, C, itemsize):
    """Choose (Bblk, tT, tC).

    BlockSpec last-two-dims constraints honoured:
      x   (Bblk, tT, tC): tT multiple of 8 or == T; tC multiple of 128 or == C
      m   (Bblk, tT, 1) : tT multiple of 8 or == T; 1 is the full dim
      out (Bblk, tC)    : Bblk multiple of 8 or == B; tC multiple of 128 or == C
    Budget: padded bytes of one x block + one mask block <= _TARGET_BLOCK_BYTES.
    """
    tC = C if C <= _MAX_TC else _MAX_TC
    tC_pad = _round_up(tC, _LANES)
    # Per (batch-row, t-row) padded bytes: x row (tC_pad) + mask row (1 -> 128).
    row_bytes = (tC_pad + _LANES) * itemsize

    bb_min = B if B < _SUBLANES else _SUBLANES
    if bb_min * _round_up(T, _SUBLANES) * row_bytes <= _TARGET_BLOCK_BYTES:
        tT = T
    else:
        # Largest multiple of 128 rows that fits with the minimal batch tile
        # (floored at 128; bounded ~30% overshoot in the worst f32/wide-C case).
        tT = max(_LANES,
                 (_TARGET_BLOCK_BYTES // (bb_min * row_bytes)) // _LANES * _LANES)
        tT = min(tT, T)
    tT_pad = _round_up(tT, _SUBLANES)

    bb_fit = _TARGET_BLOCK_BYTES // (tT_pad * row_bytes)
    if B <= max(bb_min, bb_fit):
        Bblk = B
    else:
        Bblk = max(_SUBLANES, (bb_fit // _SUBLANES) * _SUBLANES)

    # v7x megacore: with a single (batch, channel) block the only remaining
    # grid axis is the serial "arbitrary" T axis, so one TensorCore idles.
    # Split the batch into at least two blocks (cheap extra grid step).
    if B >= 2 * _SUBLANES and Bblk >= B and tC >= C:
        Bblk = max(_SUBLANES, (B // 2) // _SUBLANES * _SUBLANES)

    return Bblk, tT, tC


def _masked_mean_kernel(x_ref, m_ref, out_ref, acc_ref, cnt_ref, *,
                        t_total, t_blk, guard_tail):
    # x_ref  : (Bblk, tT, tC)  input dtype
    # m_ref  : (Bblk, tT, 1)   input dtype (0/1 mask)
    # out_ref: (Bblk, tC)
    # acc_ref: (Bblk, tC) f32 running masked sum   (persists across T blocks)
    # cnt_ref: (Bblk, 1)  f32 running valid counts (persists across T blocks)
    t = pl.program_id(2)

    @pl.when(t == 0)
    def _init():
        acc_ref[...] = jnp.zeros_like(acc_ref)
        cnt_ref[...] = jnp.zeros_like(cnt_ref)

    x = x_ref[...]                      # (Bblk, tT, tC)
    valid = m_ref[...] != 0             # (Bblk, tT, 1) bool

    if guard_tail:
        # Last T block is partial: padded tail rows hold unspecified mask/x
        # data, which would otherwise pollute valid batch rows.  Static Python
        # branch: only emitted when T % tT != 0.
        rows = t * t_blk + jax.lax.broadcasted_iota(jnp.int32, valid.shape, 1)
        valid = jnp.logical_and(valid, rows < t_total)

    # Masked select in the input dtype (no full-tile f32 copy); accumulate in
    # f32.  jnp.where also keeps Inf/NaN in masked-out positions from reaching
    # the accumulator (a 0*Inf multiply would produce NaN).
    xm = jnp.where(valid, x, 0.0)
    acc_ref[...] += jnp.sum(xm, axis=1, dtype=jnp.float32)        # (Bblk, tC)
    cnt_ref[...] += jnp.sum(valid.astype(jnp.float32), axis=1)    # (Bblk, 1)

    @pl.when(t == pl.num_programs(2) - 1)
    def _finalize():
        denom = jnp.maximum(cnt_ref[...], 1.0)   # guard fully-masked rows
        out_ref[...] = (acc_ref[...] / denom).astype(out_ref.dtype)


@functools.partial(
    jax.jit, static_argnames=("n_dim", "block_b", "block_t", "block_c"))
def pooling_forward(x, mask, n_dim=1, block_b=None, block_t=None, block_c=None):
    """Masked mean pooling.

    n_dim == 1: x (B, T, C),    mask (B, T)
    n_dim == 2: x (B, H, W, C), mask (B, H, W)
    returns (B, C).  block_* optionally override the auto tiling.
    """
    assert n_dim in (1, 2)
    if n_dim == 2:
        B, H, W, C = x.shape
        x = x.reshape(B, H * W, C)
        mask = mask.reshape(B, H * W)
    B, T, C = x.shape

    # 0/1 mask in x's dtype, shaped (B, T, 1): T stays on the sublane axis so
    # the in-kernel broadcast over C is a plain lane-broadcast.
    m = mask.astype(x.dtype).reshape(B, T, 1)

    itemsize = jnp.dtype(x.dtype).itemsize
    auto_bb, auto_tt, auto_tc = _tile_sizes(B, T, C, itemsize)
    Bblk = auto_bb if block_b is None else block_b
    tT = auto_tt if block_t is None else block_t
    tC = auto_tc if block_c is None else block_c
    nb = pl.cdiv(B, Bblk)
    nc = pl.cdiv(C, tC)
    nt = pl.cdiv(T, tT)

    kernel = functools.partial(
        _masked_mean_kernel, t_total=T, t_blk=tT, guard_tail=(T % tT != 0))

    cost = pl.CostEstimate(
        flops=2 * B * T * C,
        transcendentals=0,
        bytes_accessed=int(B * T * C * itemsize   # x
                           + B * T * itemsize     # mask (logical)
                           + B * C * itemsize),   # out
    )

    out = pl.pallas_call(
        kernel,
        out_shape=jax.ShapeDtypeStruct((B, C), x.dtype),
        grid_spec=pltpu.PrefetchScalarGridSpec(
            num_scalar_prefetch=0,
            grid=(nb, nc, nt),
            in_specs=[
                pl.BlockSpec((Bblk, tT, tC), lambda b, c, t: (b, t, c)),
                pl.BlockSpec((Bblk, tT, 1), lambda b, c, t: (b, t, 0)),
            ],
            out_specs=pl.BlockSpec((Bblk, tC), lambda b, c, t: (b, c)),
            scratch_shapes=[
                pltpu.VMEM((Bblk, tC), jnp.float32),  # masked-sum accumulator
                pltpu.VMEM((Bblk, 1), jnp.float32),   # valid-count accumulator
            ],
        ),
        compiler_params=pltpu.CompilerParams(
            dimension_semantics=("parallel", "parallel", "arbitrary"),
        ),
        cost_estimate=cost,
    )(x, m)
    return out


def _reference(x, mask, n_dim):
    if n_dim == 2:
        B, H, W, C = x.shape
        x = x.reshape(B, H * W, C)
        mask = mask.reshape(B, H * W)
    mf = mask.astype(jnp.float32)
    s = jnp.einsum("btc,bt->bc", x.astype(jnp.float32), mf)
    cnt = jnp.maximum(jnp.sum(mf, axis=1, keepdims=True), 1.0)
    return (s / cnt).astype(x.dtype)


if __name__ == "__main__":
    key = jax.random.PRNGKey(0)
    k1, k2, k3, k4, k5, k6, k7 = jax.random.split(key, 7)

    # ---- n_dim = 1: (B, T, C) with a sequence-length mask ----
    B, T, C = 2, 8, 32
    x1 = jax.random.normal(k1, (B, T, C), dtype=jnp.float32)
    lens = jnp.array([5, 8], dtype=jnp.int32)
    mask1 = jnp.arange(T)[None, :] < lens[:, None]

    out1 = pooling_forward(x1, mask1, n_dim=1)
    jax.block_until_ready(out1)
    assert jnp.allclose(out1, _reference(x1, mask1, 1), atol=1e-5, rtol=1e-5)

    # ---- n_dim = 2: (B, H, W, C) with a spatial mask ----
    H, W = 4, 4
    x2 = jax.random.normal(k2, (B, H, W, C), dtype=jnp.float32)
    mask2 = jax.random.bernoulli(k3, 0.7, (B, H, W))

    out2 = pooling_forward(x2, mask2, n_dim=2)
    jax.block_until_ready(out2)
    assert jnp.allclose(out2, _reference(x2, mask2, 2), atol=1e-5, rtol=1e-5)

    # ---- multi-block batch + T reduction path: forced small tiles so the
    #      (b, c, t) grid, accumulator init/finalize, T tail guard and the
    #      batch-tail block all execute ----
    B3, T3 = 10, 20
    x3 = jax.random.normal(k4, (B3, T3, C), dtype=jnp.float32)
    mask3 = jax.random.bernoulli(k5, 0.6, (B3, T3))

    out3 = pooling_forward(x3, mask3, n_dim=1, block_b=8, block_t=8)
    jax.block_until_ready(out3)
    assert jnp.allclose(out3, _reference(x3, mask3, 1), atol=1e-5, rtol=1e-5)

    # ---- wide-channel path: C > 512 exercises the channel grid axis with a
    #      partial C tail block ----
    B4, T4, C4 = 4, 64, 640
    x4 = jax.random.normal(k6, (B4, T4, C4), dtype=jnp.float32)
    mask4 = jax.random.bernoulli(k7, 0.5, (B4, T4))

    out4 = pooling_forward(x4, mask4, n_dim=1)
    jax.block_until_ready(out4)
    assert jnp.allclose(out4, _reference(x4, mask4, 1), atol=1e-5, rtol=1e-5)

    print("KERNEL_OK")
</pallas_src>

<mosaic_0001>
module attributes {stable_mosaic.version = 11 : i64} {
  func.func @_masked_mean_kernel(%arg0: i32, %arg1: i32, %arg2: i32, %arg3: memref<2x8x32xf32, #tpu.memory_space<vmem>>, %arg4: memref<2x8x1xf32, #tpu.memory_space<vmem>>, %arg5: memref<2x32xf32, #tpu.memory_space<vmem>>, %arg6: memref<2x32xf32, #tpu.memory_space<vmem>>, %arg7: memref<2x1xf32, #tpu.memory_space<vmem>>) attributes {dimension_semantics = [#tpu.dimension_semantics<parallel>, #tpu.dimension_semantics<parallel>, #tpu.dimension_semantics<arbitrary>], iteration_bounds = array<i64: 1, 1, 1>, scalar_prefetch = 0 : i64, scratch_operands = 2 : i64, tpu.core_type = #tpu.core_type<tc>, window_params = [{transform_indices = @transform_0, window_bounds = array<i64: 2, 8, 32>}, {transform_indices = @transform_1, window_bounds = array<i64: 2, 8, 1>}, {transform_indices = @transform_2, window_bounds = array<i64: 2, 32>}]} {
    %c0_i32 = arith.constant 0 : i32
    %0 = arith.cmpi eq, %arg2, %c0_i32 : i32
    %1 = arith.extui %0 : i1 to i32
    %c0_i32_0 = arith.constant 0 : i32
    %2 = arith.cmpi ne, %1, %c0_i32_0 : i32
    scf.if %2 {
      %cst_19 = arith.constant 0.000000e+00 : f32
      %24 = vector.broadcast %cst_19 : f32 to vector<2x32xf32>
      %c0_20 = arith.constant 0 : index
      %c0_21 = arith.constant 0 : index
      %25 = vector.load %arg6[%c0_20, %c0_21] : memref<2x32xf32, #tpu.memory_space<vmem>>, vector<2x32xf32>
      tpu.vector_store %arg6[%c0_20, %c0_21], %24 {strides = array<i32>} : memref<2x32xf32, #tpu.memory_space<vmem>>, vector<2x32xf32>,
      %cst_22 = arith.constant 0.000000e+00 : f32
      %26 = vector.broadcast %cst_22 : f32 to vector<2x1xf32>
      %c0_23 = arith.constant 0 : index
      %c0_24 = arith.constant 0 : index
      %27 = vector.load %arg7[%c0_23, %c0_24] : memref<2x1xf32, #tpu.memory_space<vmem>>, vector<2x1xf32>
      tpu.vector_store %arg7[%c0_23, %c0_24], %26 {strides = array<i32>} : memref<2x1xf32, #tpu.memory_space<vmem>>, vector<2x1xf32>,
    } else {
    }
    %c0 = arith.constant 0 : index
    %c0_1 = arith.constant 0 : index
    %c0_2 = arith.constant 0 : index
    %3 = vector.load %arg3[%c0, %c0_1, %c0_2] : memref<2x8x32xf32, #tpu.memory_space<vmem>>, vector<2x8x32xf32>
    %c0_3 = arith.constant 0 : index
    %c0_4 = arith.constant 0 : index
    %c0_5 = arith.constant 0 : index
    %4 = vector.load %arg4[%c0_3, %c0_4, %c0_5] : memref<2x8x1xf32, #tpu.memory_space<vmem>>, vector<2x8x1xf32>
    %cst = arith.constant 0.000000e+00 : f32
    %5 = vector.broadcast %cst : f32 to vector<2x8x1xf32>
    %6 = arith.cmpf one, %4, %5 : vector<2x8x1xf32>
    %cst_6 = arith.constant 0.000000e+00 : f32
    %7 = vector.shape_cast %6 : vector<2x8x1xi1> to vector<2x8x1xi1>
    %8 = vector.broadcast %7 : vector<2x8x1xi1> to vector<2x8x32xi1>
    %9 = vector.broadcast %cst_6 : f32 to vector<2x8x32xf32>
    %10 = arith.select %8, %3, %9 : vector<2x8x32xi1>, vector<2x8x32xf32>
    %c0_7 = arith.constant 0 : index
    %c0_8 = arith.constant 0 : index
    %11 = vector.load %arg6[%c0_7, %c0_8] : memref<2x32xf32, #tpu.memory_space<vmem>>, vector<2x32xf32>
    %cst_9 = arith.constant dense<0.000000e+00> : vector<2x32xf32>
    %12 = vector.multi_reduction <add>, %10, %cst_9 [1] : vector<2x8x32xf32> to vector<2x32xf32>
    %13 = arith.addf %11, %12 : vector<2x32xf32>
    %c0_10 = arith.constant 0 : index
    %c0_11 = arith.constant 0 : index
    %14 = vector.load %arg6[%c0_10, %c0_11] : memref<2x32xf32, #tpu.memory_space<vmem>>, vector<2x32xf32>
    tpu.vector_store %arg6[%c0_10, %c0_11], %13 {strides = array<i32>} : memref<2x32xf32, #tpu.memory_space<vmem>>, vector<2x32xf32>,
    %c0_12 = arith.constant 0 : index
    %c0_13 = arith.constant 0 : index
    %15 = vector.load %arg7[%c0_12, %c0_13] : memref<2x1xf32, #tpu.memory_space<vmem>>, vector<2x1xf32>
    %16 = arith.extui %6 : vector<2x8x1xi1> to vector<2x8x1xi32>
    %17 = arith.sitofp %16 : vector<2x8x1xi32> to vector<2x8x1xf32>
    %cst_14 = arith.constant dense<0.000000e+00> : vector<2x1xf32>
    %18 = vector.multi_reduction <add>, %17, %cst_14 [1] : vector<2x8x1xf32> to vector<2x1xf32>
    %19 = arith.addf %15, %18 : vector<2x1xf32>
    %c0_15 = arith.constant 0 : index
    %c0_16 = arith.constant 0 : index
    %20 = vector.load %arg7[%c0_15, %c0_16] : memref<2x1xf32, #tpu.memory_space<vmem>>, vector<2x1xf32>
    tpu.vector_store %arg7[%c0_15, %c0_16], %19 {strides = array<i32>} : memref<2x1xf32, #tpu.memory_space<vmem>>, vector<2x1xf32>,
    %c0_i32_17 = arith.constant 0 : i32
    %21 = arith.cmpi eq, %arg2, %c0_i32_17 : i32
    %22 = arith.extui %21 : i1 to i32
    %c0_i32_18 = arith.constant 0 : i32
    %23 = arith.cmpi ne, %22, %c0_i32_18 : i32
    scf.if %23 {
      %c0_19 = arith.constant 0 : index
      %c0_20 = arith.constant 0 : index
      %24 = vector.load %arg7[%c0_19, %c0_20] : memref<2x1xf32, #tpu.memory_space<vmem>>, vector<2x1xf32>
      %cst_21 = arith.constant 1.000000e+00 : f32
      %25 = vector.broadcast %cst_21 : f32 to vector<2x1xf32>
      %26 = arith.maximumf %24, %25 : vector<2x1xf32>
      %c0_22 = arith.constant 0 : index
      %c0_23 = arith.constant 0 : index
      %27 = vector.load %arg6[%c0_22, %c0_23] : memref<2x32xf32, #tpu.memory_space<vmem>>, vector<2x32xf32>
      %28 = vector.broadcast %26 : vector<2x1xf32> to vector<2x32xf32>
      %29 = arith.divf %27, %28 : vector<2x32xf32>
      %c0_24 = arith.constant 0 : index
      %c0_25 = arith.constant 0 : index
      %30 = vector.load %arg5[%c0_24, %c0_25] : memref<2x32xf32, #tpu.memory_space<vmem>>, vector<2x32xf32>
      tpu.vector_store %arg5[%c0_24, %c0_25], %29 {strides = array<i32>} : memref<2x32xf32, #tpu.memory_space<vmem>>, vector<2x32xf32>,
    } else {
    }
    return
  }
  func.func @transform_0(%arg0: i32, %arg1: i32, %arg2: i32) -> (i32, i32, i32) {
    %c0_i32 = arith.constant 0 : i32
    return %arg0, %arg2, %arg1 : i32, i32, i32
  }
  func.func @transform_1(%arg0: i32, %arg1: i32, %arg2: i32) -> (i32, i32, i32) {
    %c0_i32 = arith.constant 0 : i32
    %c0_i32_0 = arith.constant 0 : i32
    return %arg0, %arg2, %c0_i32 : i32, i32, i32
  }
  func.func @transform_2(%arg0: i32, %arg1: i32, %arg2: i32) -> (i32, i32) {
    %c0_i32 = arith.constant 0 : i32
    return %arg0, %arg1 : i32, i32
  }
}

</mosaic_0001>

<bundles_post_ra>
// kernel: pooling_forward.1
= control target key start
LH: loop header
LB: loop body
LE: loop exit
PB: predicated region body
PF: predicated region fallthrough
CT: control target
= control target key end

     0   :  { %vm65_vm0 = vcmask 7168   ;;  %vm18_vm1 = vcmask 1024   ;;  %v148_v2 = vmov 0   ;;  %v149_v3 = vmov 0.0   ;;  %s199_s0 = inlined_call_operand.vmem [shape: f32[2,8,32], index: 0, kind: input, shape index: {}]   ;;  %s200_s1 = inlined_call_operand.vmem [shape: f32[2,8,1], index: 1, kind: input, shape index: {}]   ;;  %s201_s2 = inlined_call_operand.hbm [shape: f32[2,32], index: 2, kind: output, shape index: {}]  }
   0x1   :  { %v22_v0 = vld [vmem:[%s200_s1] sm:$0xff]  ;;  %v23_v1 = vld [vmem:[%s200_s1 + $0x8] sm:$0xff]  ;;  %120 = vset.pattern.permute.xlu0 %v148_v2  ;;  %19 = vst.msk [vmem:[#allocation3] sm:$0x3] %vm18_vm1, %v149_v3  ;;  %121 = vset.pattern.permute.xlu1 %v148_v2 }
   0x2   :  { %vm24_vm2 = vcmp.ne.f32.partialorder %v22_v0, 0.0  ;;  %vm25_vm3 = vcmp.ne.f32.partialorder %v23_v1, 0.0 }
   0x3   :  { %7 = vsyncpa [#allocation5], 0  ;;  %v26_v4 = vsel %vm24_vm2, 1, %v148_v2  ;;  %v115_v5 = vsel %vm24_vm2, 1.0, %v149_v3  ;;  %v116_v6 = vsel %vm25_vm3, 1.0, %v149_v3  ;;  %v27_v10 = vsel %vm25_vm3, 1, %v148_v2 }
   0x4   :  { %29 = vperm.xlu0 %120, %v26_v4   ;;  %v66_v7 = vsel %vm65_vm0, %v115_v5, 0.0  ;;  %v73_v8 = vsel %vm65_vm0, %v116_v6, 0.0  ;;  %vm56_vm4 = vcmask 1041409   ;;  %vm16_vm5 = vcmask 254976   ;;  %v20_v27 = vld [vmem:[%s199_s0] sm:$0xff]  ;;  %v21_v31 = vld [vmem:[%s199_s0 + $0x8] sm:$0xff] }
   0x5   :  { %v67_v9 = vrot.slane %v66_v7, 4  ;;  %v74_v11 = vrot.slane %v73_v8, 4  ;;  %17 = vst.msk [vmem:[#allocation2] sm:$0x3] %vm16_vm5, %v149_v3  ;;  %vm39_vm6 = vcmask 261120   ;;  %s150_s0 = smov [#allocation4]  }
   0x6   :  { %s107_s16 = sshll.u32 %s150_s0, 4  ;;  %s108_s16 = int_to_ptr.vmem [resolvable:$true] %s107_s16 }
   0x7   :  { %v68_v12 = vadd.f32 %v67_v9, %v66_v7  ;;  %v75_v13 = vadd.f32 %v74_v11, %v73_v8  ;;  %s124_s17 = scalar_lea.vmem %s108_s16, 32  ;;  %p129_p1 = scmp.lt.s32.totalorder %s108_s16, %s108_s16 }
   0x8   :  { %32 = vperm.xlu0 %120, %v27_v10   ;;  %v62_v21 = vld [vmem:[#allocation3] sm:$0x3]  ;;  %p125_p0 = scmp.ne.s32.totalorder %s108_s16, %s124_s17  ;;  %p130_p2 = scmp.lt.s32.totalorder %s124_s17, %s124_s17 }
   0x9   :  { %v69_v14 = vrot.slane %v68_v12, 2  ;;  %v76_v15 = vrot.slane %v75_v13, 2 }
   0xa   :  { %p131_p3 = por %p130_p2, %p129_p1 }
   0xb   :  { %v70_v16 = vadd.f32 %v69_v14, %v68_v12  ;;  %v77_v17 = vadd.f32 %v76_v15, %v75_v13 }
   0xc   :  { %v38_v47 = vld [vmem:[#allocation2] sm:$0x3]  ;;  %p132_p4 = pnand %p131_p3, %p125_p0 }
   0xd   :  { %v71_v18 = vrot.slane %v70_v16, 1  ;;  %v78_v19 = vrot.slane %v77_v17, 1 }
   0xf   :  { %v72_v20 = vadd.f32 %v71_v18, %v70_v16  ;;  %v79_v22 = vadd.f32 %v78_v19, %v77_v17 }
  0x11   :  { %v82_v23 = vsel %vm56_vm4, %v79_v22, %v72_v20 }
  0x12   :  { %v84_v24 = vadd.f32 %v82_v23, %v62_v21 }
  0x14   :  { %86 = vst.msk [vmem:[#allocation3] sm:$0x3] %vm18_vm1, %v84_v24 }
  0x1b   :  { %v90_v25 = vld [vmem:[#allocation3] sm:$0x3] }
  0x1c   :  { %v91_v26 = vmax.f32 %v90_v25, 1.0 }
  0x1e   :  { %95 = vperm.xlu1 %121, %v91_v26  }
  0x83   :  { %v30_v28 = vpop.permute.xlu0 %29 }
  0x84   :  { %vm34_vm7 = vcmp.eq.s32.totalorder %v30_v28, 1 }
  0x85   :  { %v36_v29 = vsel %vm34_vm7, %v20_v27, 0.0 }
  0x86   :  { %v40_v30 = vsel %vm39_vm6, %v36_v29, 0.0 }
  0x87   :  { %v41_v32 = vrot.slane %v40_v30, 4  ;;  %v33_v33 = vpop.permute.xlu0 %32 }
  0x88   :  { %vm35_vm8 = vcmp.eq.s32.totalorder %v33_v33, 1 }
  0x89   :  { %v42_v34 = vadd.f32 %v41_v32, %v40_v30  ;;  %v37_v35 = vsel %vm35_vm8, %v21_v31, 0.0 }
  0x8a   :  { %v47_v36 = vsel %vm39_vm6, %v37_v35, 0.0 }
  0x8b   :  { %v43_v37 = vrot.slane %v42_v34, 2  ;;  %v48_v38 = vrot.slane %v47_v36, 4 }
  0x8d   :  { %v44_v39 = vadd.f32 %v43_v37, %v42_v34  ;;  %v49_v40 = vadd.f32 %v48_v38, %v47_v36 }
  0x8f   :  { %v50_v41 = vrot.slane %v49_v40, 2  ;;  %v45_v42 = vrot.slane %v44_v39, 1 }
  0x91   :  { %v51_v43 = vadd.f32 %v50_v41, %v49_v40  ;;  %v46_v45 = vadd.f32 %v45_v42, %v44_v39 }
  0x93   :  { %v52_v44 = vrot.slane %v51_v43, 1 }
  0x95   :  { %v53_v46 = vadd.f32 %v52_v44, %v51_v43 }
  0x97   :  { %v57_v48 = vsel %vm56_vm4, %v53_v46, %v46_v45 }
  0x98   :  { %v59_v49 = vadd.f32 %v57_v48, %v38_v47 }
  0x9a   :  { %61 = vst.msk [vmem:[#allocation2] sm:$0x3] %vm16_vm5, %v59_v49 }
  0x9d   :  { %v96_v50 = vpop.permute.xlu1 %95 }
  0x9e   :  { %122 = vrcp.f32 %v96_v50 }
  0xa1   :  { %v92_v52 = vld [vmem:[#allocation2] sm:$0x3] }
  0xa8   :  { %v123_v51 = vpop.eup %122 }
  0xa9   :  { %v99_v53 = vmul.f32 %v123_v51, %v92_v52 }
  0xab   :  { %100 = vst.msk [vmem:[#allocation4] sm:$0x3] %vm16_vm5, %v99_v53 }
  0xac   :  { %135 = shalt.err (!%p132_p4)
}
  0xad   :  { %s136_s20 = scalar_lea.hbm %s201_s2, 32 }
  0xae   :  { %p137_p5 = scmp.ne.s32.totalorder %s201_s2, %s136_s20  ;;  %p140_p6 = scmp.lt.u32.totalorder %s136_s20, %s201_s2 }
  0xb0   :  { %p142_p7 = pnand %p140_p6, %p137_p5 }
  0xb2   :  { %145 = shalt.err (!%p142_p7)
}
  0xb3   :  { %110 = dma.vmem_to_hbm [thread:$0]  %s108_s16, 32, %s201_s2, [#allocation5]  }
  0xb4   :  { %146 = dma.done.wait [#allocation5], 32  }
  0xb5   :  { %147 = vsyncadd [#allocation5], 4294967264 }
  0xb6   :  { %114 = vsyncpa [#allocation5], 1 }

</bundles_post_ra>
